<compile_context>
chip_gen: v5e
topology: v5e:2x2
jax: 0.10.0
libtpu: 0.0.40
codegen_flags: <defaults>
</compile_context>

<pallas_src>
import functools

import jax
import jax.numpy as jnp
from jax.experimental import pallas as pl
from jax.experimental.pallas import tpu as pltpu


def _round_up(x, m):
    return (x + m - 1) // m * m


def _chunk_kernel(xa_ref, xi_ref, h0_ref, wa_ref, wi_ref, pp_ref,
                  out_ref, hfinal_ref, xinext_ref,
                  fc_scr, gate_scr, *, t_valid, tail_mask):
    """Process one (out_tile n, batch_tile b, time_chunk tc) grid point."""
    tc = pl.program_id(2)

    # h is carried in the resident h_final output block (its block index is
    # constant over the time axis) -> init it from h0 at the first chunk.
    @pl.when(tc == 0)
    def _():
        hfinal_ref[...] = h0_ref[...]

    Tc, TB, inp = xa_ref.shape
    TN = out_ref.shape[-1]
    mxu_dtype = wa_ref.dtype

    pp = pp_ref[...]                              # (4, TN) f32
    ba, bi, tresh, decay = pp[0:1], pp[1:2], pp[2:3], pp[3:4]

    # Whole-chunk matmuls: M = Tc*TB rows per MXU call instead of TB.
    xa = xa_ref[...].astype(mxu_dtype).reshape(Tc * TB, inp)
    xi = xi_ref[...].astype(mxu_dtype).reshape(Tc * TB, inp)
    fc = jnp.dot(xa, wa_ref[...], preferred_element_type=jnp.float32) + ba
    logits = jnp.dot(xi, wi_ref[...], preferred_element_type=jnp.float32) + bi

    # One hoisted sigmoid pass for the whole chunk (off the serial recurrence).
    act = jax.nn.sigmoid(logits)
    xinext_ref[...] = act.reshape(Tc, TB, TN).astype(xinext_ref.dtype)

    # relu(act - tresh) followed by BumpFunction binarize (>0)  ==  (act > tresh);
    # fold decay into a single per-step gate multiplier, staged in VMEM scratch.
    fc_scr[...] = fc.reshape(Tc, TB, TN)
    gate_scr[...] = jnp.where(act > tresh, decay, 0.0).reshape(Tc, TB, TN)

    # Short unrolled recurrence: per-step serial work is one mul + one add (VPU);
    # tanh feeds only the output stream, not the carry.
    h = hfinal_ref[...]
    for s in range(Tc):
        h_new = h * gate_scr[s] + fc_scr[s]
        if tail_mask:
            h = jnp.where(tc * Tc + s < t_valid, h_new, h)   # freeze h on padded steps
        else:
            h = h_new
        out_ref[s] = jnp.tanh(h_new).astype(out_ref.dtype)
    hfinal_ref[...] = h


def _vmem_bytes(Tc, TB, TN, INP_pad, x_bytes, mxu_bytes):
    """Rough resident-VMEM estimate for one grid point (default double buffering)."""
    w = 2 * 2 * INP_pad * TN * mxu_bytes            # Wa + Wi, x2 buffers
    pp = 2 * 4 * TN * 4                             # packed per-feature params
    h = 2 * 2 * TB * TN * 4                         # h0 (in) + h_final (out)
    x = 2 * 2 * Tc * TB * INP_pad * x_bytes         # x_a + x_i chunks
    o = 2 * 2 * Tc * TB * TN * 2                    # out + x_i_next (bf16) chunks
    scr = 2 * Tc * TB * TN * 4                      # fc + gate scratch
    return w + pp + h + x + o + scr


@functools.partial(jax.jit, static_argnames=("out_dim",))
def _run_seq(x_a_seq, x_i_seq, h0, wa, wi, pp, *, out_dim):
    T, B, INP = x_a_seq.shape
    INP_pad, OUT_pad = wa.shape
    mxu_dtype = wa.dtype
    mxu_bytes = wa.dtype.itemsize

    # ---- tile selection --------------------------------------------------
    # Batch tile: multiple of 16 (bf16 sublane packing); 256 when B is large
    # (fills the 256x256 MXUs on v6e/v7x in one pass).
    TB = 256 if B >= 256 else min(128, _round_up(B, 16))
    B_pad = _round_up(B, TB)
    nb = B_pad // TB

    # OUT-feature tiling: bound resident (double-buffered) Wa+Wi to ~16 MiB so big
    # models fit v7x's 64 MiB VMEM, and ensure >=2 parallel grid tiles (2 TCs)
    # when the batch axis alone provides only one.
    tiles128 = OUT_pad // 128
    weight_budget = 16 << 20
    nn = tiles128                                   # fallback: finest tiling
    for cand in range(1, tiles128 + 1):
        if tiles128 % cand:
            continue
        tn_c = OUT_pad // cand
        fits = 2 * 2 * INP_pad * tn_c * mxu_bytes <= weight_budget
        enough_parallel = (nb * cand >= 2) or (cand == tiles128)
        if fits and enough_parallel:
            nn = cand
            break
    TN = OUT_pad // nn

    # Time chunk: amortize grid-step overhead; shrink until blocks fit ~40 MiB
    # (headroom under v7x's 64 MiB; conservative 4-byte x estimate).
    Tc = max(1, min(16, T))
    while Tc > 1 and _vmem_bytes(Tc, TB, TN, INP_pad, 4, mxu_bytes) > (40 << 20):
        Tc //= 2
    T_pad = _round_up(T, Tc)
    nt = T_pad // Tc

    # ---- input staging (skip the pad/cast HBM pass when already aligned) --
    needs_x_pad = (T_pad != T) or (B_pad != B) or (INP_pad != INP)
    if needs_x_pad:
        def pad_x(x):
            return jnp.pad(x.astype(mxu_dtype),
                           ((0, T_pad - T), (0, B_pad - B), (0, INP_pad - INP)))
        xa, xi = pad_x(x_a_seq), pad_x(x_i_seq)
    else:
        xa, xi = x_a_seq, x_i_seq        # cast to bf16 happens inside the kernel

    if (B_pad != B) or (OUT_pad != out_dim) or h0.dtype != jnp.float32:
        h0p = jnp.pad(h0.astype(jnp.float32),
                      ((0, B_pad - B), (0, OUT_pad - out_dim)))
    else:
        h0p = h0

    kernel = functools.partial(_chunk_kernel, t_valid=T, tail_mask=(T_pad != T))
    seq_shape = jax.ShapeDtypeStruct((T_pad, B_pad, OUT_pad), jnp.bfloat16)
    vmem_limit = int(min(max(2 * _vmem_bytes(Tc, TB, TN, INP_pad,
                                             xa.dtype.itemsize, mxu_bytes),
                             32 << 20), 100 << 20))

    out_seq, h_final, xinext_seq = pl.pallas_call(
        kernel,
        grid_spec=pltpu.PrefetchScalarGridSpec(
            num_scalar_prefetch=0,
            # weights change only with the outermost axis (fetched nn times total);
            # time axis is innermost so the h carry stays resident per (n, b) tile.
            grid=(nn, nb, nt),
            in_specs=[
                pl.BlockSpec((Tc, TB, INP_pad), lambda n, b, t: (t, b, 0)),   # x_a chunk
                pl.BlockSpec((Tc, TB, INP_pad), lambda n, b, t: (t, b, 0)),   # x_i chunk
                pl.BlockSpec((TB, TN), lambda n, b, t: (b, n)),               # h0
                pl.BlockSpec((INP_pad, TN), lambda n, b, t: (0, n)),          # Wa (resident)
                pl.BlockSpec((INP_pad, TN), lambda n, b, t: (0, n)),          # Wi (resident)
                pl.BlockSpec((4, TN), lambda n, b, t: (0, n)),                # [ba;bi;tresh;decay]
            ],
            out_specs=[
                pl.BlockSpec((Tc, TB, TN), lambda n, b, t: (t, b, n)),        # out seq (bf16)
                pl.BlockSpec((TB, TN), lambda n, b, t: (b, n)),               # h_final (f32, carries h)
                pl.BlockSpec((Tc, TB, TN), lambda n, b, t: (t, b, n)),        # x_i_next seq (bf16)
            ],
            scratch_shapes=[pltpu.VMEM((Tc, TB, TN), jnp.float32),            # fc chunk
                            pltpu.VMEM((Tc, TB, TN), jnp.float32)],           # gate chunk
        ),
        out_shape=(seq_shape,
                   jax.ShapeDtypeStruct((B_pad, OUT_pad), jnp.float32),
                   seq_shape),
        input_output_aliases={2: 1},      # h0 HBM buffer reused for h_final
        compiler_params=pltpu.CompilerParams(
            dimension_semantics=("parallel", "parallel", "arbitrary"),
            vmem_limit_bytes=vmem_limit),
    )(xa, xi, h0p, wa, wi, pp)

    return (out_seq[:T, :B, :out_dim],
            h_final[:B, :out_dim],
            xinext_seq[:T, :B, :out_dim])


def prepare_params(params, mxu_dtype=jnp.bfloat16):
    """One-time param prep: transpose PyTorch-layout weights to [INP, OUT], pad
    feature dims to multiples of 128, cast MXU operands (bf16 by default; pass
    jnp.float32 for exact-parity matmuls), and pack per-feature params into one
    (4, OUT_pad) f32 operand."""
    out_dim, inp_dim = params["Wa"].shape
    INP_pad = _round_up(inp_dim, 128)
    OUT_pad = _round_up(out_dim, 128)

    def prep_w(w):
        w = jnp.asarray(w, jnp.float32).T                       # [INP, OUT]
        w = jnp.pad(w, ((0, INP_pad - inp_dim), (0, OUT_pad - out_dim)))
        return w.astype(mxu_dtype)

    def prep_v(v):
        return jnp.pad(jnp.asarray(v, jnp.float32), (0, OUT_pad - out_dim))

    pp = jnp.stack([prep_v(params["ba"]), prep_v(params["bi"]),
                    prep_v(params["tresh"]), prep_v(params["decay"])], axis=0)
    return {"wa": prep_w(params["Wa"]), "wi": prep_w(params["Wi"]),
            "pp": pp, "out": out_dim}


def inhibit_add_decay_scan(x_a_seq, h0, x_i_seq, prep):
    """Run the cell over a [T, B, INP] sequence with the recurrence inside the
    kernel. Returns (out_seq [T,B,OUT] bf16, h_final [B,OUT] f32,
    x_i_next_seq [T,B,OUT] bf16)."""
    return _run_seq(x_a_seq, x_i_seq, h0, prep["wa"], prep["wi"], prep["pp"],
                    out_dim=prep["out"])


def inhibit_add_decay(x_a, h, x_i, prep):
    """Single-step interface matching InhibitAddDecay.forward(x_a, h, x_i)."""
    out_seq, h_next, xinext_seq = inhibit_add_decay_scan(
        x_a[None], h, x_i[None], prep)
    return out_seq[0], h_next, xinext_seq[0]


def _init_params(key, inp, out):
    """Deterministic param init mirroring the PyTorch __init__ shapes/distributions."""
    k = jax.random.split(key, 6)
    bound = 1.0 / jnp.sqrt(inp)
    Wa = jax.random.uniform(k[0], (out, inp), jnp.float32, -bound, bound)
    ba = jax.random.uniform(k[1], (out,), jnp.float32, -bound, bound)
    Wi = jax.random.uniform(k[2], (out, inp), jnp.float32, -bound, bound)
    bi = jax.random.uniform(k[3], (out,), jnp.float32, -bound, bound)
    # tresh = |U[0,1)| * 0.2 + 0.7 ; decay = |U[0,1)| * 0.7 + 0.1
    tresh = jnp.abs(jax.random.uniform(k[4], (out,), jnp.float32)) * 0.2 + 0.7
    decay = jnp.abs(jax.random.uniform(k[5], (out,), jnp.float32)) * 0.7 + 0.1
    return dict(Wa=Wa, ba=ba, Wi=Wi, bi=bi, tresh=tresh, decay=decay)


def _reference_step(x_a, h, x_i, p, mxu_dtype=jnp.bfloat16):
    """Pure-JAX reference with the same MXU precision (bf16 in, f32 accumulate)."""
    wa = p["Wa"].astype(mxu_dtype)
    wi = p["Wi"].astype(mxu_dtype)
    fc = jnp.dot(x_a.astype(mxu_dtype), wa.T,
                 preferred_element_type=jnp.float32) + p["ba"]
    act = jax.nn.sigmoid(jnp.dot(x_i.astype(mxu_dtype), wi.T,
                                 preferred_element_type=jnp.float32) + p["bi"])
    inhibit = (jnp.maximum(act - p["tresh"], 0.0) > 0).astype(jnp.float32)
    h_next = h * inhibit * p["decay"] + fc
    return jnp.tanh(h_next), h_next, act


if __name__ == "__main__":
    T, B, INP, OUT = 8, 8, 32, 32
    key = jax.random.PRNGKey(0)
    kxa, kxi, kh, kp = jax.random.split(key, 4)
    x_a_seq = jax.random.normal(kxa, (T, B, INP), jnp.float32)
    x_i_seq = jax.random.normal(kxi, (T, B, INP), jnp.float32)
    h0 = jax.random.normal(kh, (B, OUT), jnp.float32)
    params = _init_params(kp, INP, OUT)

    prep = prepare_params(params)          # one-time weight transpose / pad / cast

    # Sequence kernel: time-chunked recurrence inside the kernel.
    out_seq, h_final, xinext_seq = inhibit_add_decay_scan(x_a_seq, h0, x_i_seq, prep)
    jax.block_until_ready((out_seq, h_final, xinext_seq))

    # Reference: step the cell in pure JAX.
    h = h0
    ref_out, ref_xin = [], []
    for t in range(T):
        o, h, xin = _reference_step(x_a_seq[t], h, x_i_seq[t], params)
        ref_out.append(o)
        ref_xin.append(xin)
    ref_out = jnp.stack(ref_out)
    ref_xin = jnp.stack(ref_xin)

    # out/x_i_next are emitted in bf16 -> compare at bf16 resolution; h is f32.
    assert jnp.allclose(out_seq.astype(jnp.float32), ref_out, atol=2e-2), "out_seq mismatch"
    assert jnp.allclose(h_final, h, atol=1e-3), "h_final mismatch"
    assert jnp.allclose(xinext_seq.astype(jnp.float32), ref_xin, atol=2e-2), "x_i_next mismatch"

    # Single-step interface (matches the PyTorch module's forward signature).
    o1, h1, x1 = inhibit_add_decay(x_a_seq[0], h0, x_i_seq[0], prep)
    jax.block_until_ready((o1, h1, x1))
    ro, rh, rx = _reference_step(x_a_seq[0], h0, x_i_seq[0], params)
    assert jnp.allclose(o1.astype(jnp.float32), ro, atol=2e-2), "single-step out mismatch"
    assert jnp.allclose(h1, rh, atol=1e-3), "single-step h_next mismatch"
    assert jnp.allclose(x1.astype(jnp.float32), rx, atol=2e-2), "single-step x_i_next mismatch"

    print("KERNEL_OK")
</pallas_src>

<mosaic_0001>
module attributes {stable_mosaic.version = 11 : i64} {
  func.func @_chunk_kernel(%arg0: i32, %arg1: i32, %arg2: i32, %arg3: memref<8x16x128xbf16, #tpu.memory_space<vmem>>, %arg4: memref<8x16x128xbf16, #tpu.memory_space<vmem>>, %arg5: memref<16x128xf32, #tpu.memory_space<vmem>>, %arg6: memref<128x128xbf16, #tpu.memory_space<vmem>>, %arg7: memref<128x128xbf16, #tpu.memory_space<vmem>>, %arg8: memref<4x128xf32, #tpu.memory_space<vmem>>, %arg9: memref<8x16x128xbf16, #tpu.memory_space<vmem>>, %arg10: memref<16x128xf32, #tpu.memory_space<vmem>>, %arg11: memref<8x16x128xbf16, #tpu.memory_space<vmem>>, %arg12: memref<8x16x128xf32, #tpu.memory_space<vmem>>, %arg13: memref<8x16x128xf32, #tpu.memory_space<vmem>>) attributes {dimension_semantics = [#tpu.dimension_semantics<parallel>, #tpu.dimension_semantics<parallel>, #tpu.dimension_semantics<arbitrary>], iteration_bounds = array<i64: 1, 1, 1>, scalar_prefetch = 0 : i64, scratch_operands = 2 : i64, tpu.core_type = #tpu.core_type<tc>, window_params = [{transform_indices = @transform_0, window_bounds = array<i64: 8, 16, 128>}, {transform_indices = @transform_1, window_bounds = array<i64: 8, 16, 128>}, {transform_indices = @transform_2, window_bounds = array<i64: 16, 128>}, {transform_indices = @transform_3, window_bounds = array<i64: 128, 128>}, {transform_indices = @transform_4, window_bounds = array<i64: 128, 128>}, {transform_indices = @transform_5, window_bounds = array<i64: 4, 128>}, {transform_indices = @transform_6, window_bounds = array<i64: 8, 16, 128>}, {transform_indices = @transform_7, window_bounds = array<i64: 16, 128>}, {transform_indices = @transform_8, window_bounds = array<i64: 8, 16, 128>}]} {
    %c0_i32 = arith.constant 0 : i32
    %0 = arith.cmpi eq, %arg2, %c0_i32 : i32
    %1 = arith.extui %0 : i1 to i32
    %c0_i32_0 = arith.constant 0 : i32
    %2 = arith.cmpi ne, %1, %c0_i32_0 : i32
    scf.if %2 {
      %c0_93 = arith.constant 0 : index
      %c0_94 = arith.constant 0 : index
      %128 = vector.load %arg5[%c0_93, %c0_94] : memref<16x128xf32, #tpu.memory_space<vmem>>, vector<16x128xf32>
      %c0_95 = arith.constant 0 : index
      %c0_96 = arith.constant 0 : index
      %129 = vector.load %arg10[%c0_95, %c0_96] : memref<16x128xf32, #tpu.memory_space<vmem>>, vector<16x128xf32>
      tpu.vector_store %arg10[%c0_95, %c0_96], %128 {strides = array<i32>} : memref<16x128xf32, #tpu.memory_space<vmem>>, vector<16x128xf32>,
    } else {
    }
    %c0 = arith.constant 0 : index
    %c0_1 = arith.constant 0 : index
    %3 = vector.load %arg8[%c0, %c0_1] : memref<4x128xf32, #tpu.memory_space<vmem>>, vector<4x128xf32>
    %4 = vector.extract_strided_slice %3 {offsets = [0, 0], sizes = [1, 128], strides = [1, 1]} : vector<4x128xf32> to vector<1x128xf32>
    %5 = vector.extract_strided_slice %3 {offsets = [1, 0], sizes = [1, 128], strides = [1, 1]} : vector<4x128xf32> to vector<1x128xf32>
    %6 = vector.extract_strided_slice %3 {offsets = [2, 0], sizes = [1, 128], strides = [1, 1]} : vector<4x128xf32> to vector<1x128xf32>
    %7 = vector.extract_strided_slice %3 {offsets = [3, 0], sizes = [1, 128], strides = [1, 1]} : vector<4x128xf32> to vector<1x128xf32>
    %c0_2 = arith.constant 0 : index
    %c0_3 = arith.constant 0 : index
    %c0_4 = arith.constant 0 : index
    %8 = vector.load %arg3[%c0_2, %c0_3, %c0_4] : memref<8x16x128xbf16, #tpu.memory_space<vmem>>, vector<8x16x128xbf16>
    %9 = vector.shape_cast %8 : vector<8x16x128xbf16> to vector<128x128xbf16>
    %c0_5 = arith.constant 0 : index
    %c0_6 = arith.constant 0 : index
    %c0_7 = arith.constant 0 : index
    %10 = vector.load %arg4[%c0_5, %c0_6, %c0_7] : memref<8x16x128xbf16, #tpu.memory_space<vmem>>, vector<8x16x128xbf16>
    %11 = vector.shape_cast %10 : vector<8x16x128xbf16> to vector<128x128xbf16>
    %c0_8 = arith.constant 0 : index
    %c0_9 = arith.constant 0 : index
    %12 = vector.load %arg6[%c0_8, %c0_9] : memref<128x128xbf16, #tpu.memory_space<vmem>>, vector<128x128xbf16>
    %cst = arith.constant dense<0.000000e+00> : vector<128x128xf32>
    %13 = tpu.matmul %9, %12, %cst {dimension_numbers = #tpu.dot_dimension_numbers<[1], [0], [0], [1], [0, 0, 1, 1], [], []>} : vector<128x128xbf16>, vector<128x128xbf16>, vector<128x128xf32> -> vector<128x128xf32>
    %14 = vector.broadcast %4 : vector<1x128xf32> to vector<128x128xf32>
    %15 = arith.addf %13, %14 : vector<128x128xf32>
    %c0_10 = arith.constant 0 : index
    %c0_11 = arith.constant 0 : index
    %16 = vector.load %arg7[%c0_10, %c0_11] : memref<128x128xbf16, #tpu.memory_space<vmem>>, vector<128x128xbf16>
    %cst_12 = arith.constant dense<0.000000e+00> : vector<128x128xf32>
    %17 = tpu.matmul %11, %16, %cst_12 {dimension_numbers = #tpu.dot_dimension_numbers<[1], [0], [0], [1], [0, 0, 1, 1], [], []>} : vector<128x128xbf16>, vector<128x128xbf16>, vector<128x128xf32> -> vector<128x128xf32>
    %18 = vector.broadcast %5 : vector<1x128xf32> to vector<128x128xf32>
    %19 = arith.addf %17, %18 : vector<128x128xf32>
    %20 = arith.negf %19 : vector<128x128xf32>
    %21 = math.exp %20 : vector<128x128xf32>
    %cst_13 = arith.constant 1.000000e+00 : f32
    %22 = vector.broadcast %cst_13 : f32 to vector<128x128xf32>
    %23 = arith.addf %22, %21 : vector<128x128xf32>
    %24 = arith.divf %22, %23 : vector<128x128xf32>
    %25 = vector.shape_cast %24 : vector<128x128xf32> to vector<8x16x128xf32>
    %26 = arith.truncf %25 : vector<8x16x128xf32> to vector<8x16x128xbf16>
    %c0_14 = arith.constant 0 : index
    %c0_15 = arith.constant 0 : index
    %c0_16 = arith.constant 0 : index
    %27 = vector.load %arg11[%c0_14, %c0_15, %c0_16] : memref<8x16x128xbf16, #tpu.memory_space<vmem>>, vector<8x16x128xbf16>
    tpu.vector_store %arg11[%c0_14, %c0_15, %c0_16], %26 {strides = array<i32>} : memref<8x16x128xbf16, #tpu.memory_space<vmem>>, vector<8x16x128xbf16>,
    %28 = vector.shape_cast %15 : vector<128x128xf32> to vector<8x16x128xf32>
    %c0_17 = arith.constant 0 : index
    %c0_18 = arith.constant 0 : index
    %c0_19 = arith.constant 0 : index
    %29 = vector.load %arg12[%c0_17, %c0_18, %c0_19] : memref<8x16x128xf32, #tpu.memory_space<vmem>>, vector<8x16x128xf32>
    tpu.vector_store %arg12[%c0_17, %c0_18, %c0_19], %28 {strides = array<i32>} : memref<8x16x128xf32, #tpu.memory_space<vmem>>, vector<8x16x128xf32>,
    %30 = vector.broadcast %6 : vector<1x128xf32> to vector<128x128xf32>
    %31 = arith.cmpf ogt, %24, %30 : vector<128x128xf32>
    %cst_20 = arith.constant 0.000000e+00 : f32
    %32 = vector.shape_cast %7 : vector<1x128xf32> to vector<1x128xf32>
    %33 = vector.broadcast %32 : vector<1x128xf32> to vector<128x128xf32>
    %34 = vector.broadcast %cst_20 : f32 to vector<128x128xf32>
    %35 = arith.select %31, %33, %34 : vector<128x128xi1>, vector<128x128xf32>
    %36 = vector.shape_cast %35 : vector<128x128xf32> to vector<8x16x128xf32>
    %c0_21 = arith.constant 0 : index
    %c0_22 = arith.constant 0 : index
    %c0_23 = arith.constant 0 : index
    %37 = vector.load %arg13[%c0_21, %c0_22, %c0_23] : memref<8x16x128xf32, #tpu.memory_space<vmem>>, vector<8x16x128xf32>
    tpu.vector_store %arg13[%c0_21, %c0_22, %c0_23], %36 {strides = array<i32>} : memref<8x16x128xf32, #tpu.memory_space<vmem>>, vector<8x16x128xf32>,
    %c0_24 = arith.constant 0 : index
    %c0_25 = arith.constant 0 : index
    %38 = vector.load %arg10[%c0_24, %c0_25] : memref<16x128xf32, #tpu.memory_space<vmem>>, vector<16x128xf32>
    %c0_26 = arith.constant 0 : index
    %c0_27 = arith.constant 0 : index
    %c0_28 = arith.constant 0 : index
    %39 = vector.load %arg13[%c0_26, %c0_27, %c0_28] : memref<8x16x128xf32, #tpu.memory_space<vmem>>, vector<1x16x128xf32>
    %40 = vector.shape_cast %39 : vector<1x16x128xf32> to vector<16x128xf32>
    %41 = arith.mulf %38, %40 : vector<16x128xf32>
    %c0_29 = arith.constant 0 : index
    %c0_30 = arith.constant 0 : index
    %c0_31 = arith.constant 0 : index
    %42 = vector.load %arg12[%c0_29, %c0_30, %c0_31] : memref<8x16x128xf32, #tpu.memory_space<vmem>>, vector<1x16x128xf32>
    %43 = vector.shape_cast %42 : vector<1x16x128xf32> to vector<16x128xf32>
    %44 = arith.addf %41, %43 : vector<16x128xf32>
    %45 = math.tanh %44 : vector<16x128xf32>
    %46 = arith.truncf %45 : vector<16x128xf32> to vector<16x128xbf16>
    %c0_32 = arith.constant 0 : index
    %c0_33 = arith.constant 0 : index
    %c0_34 = arith.constant 0 : index
    %47 = vector.load %arg9[%c0_32, %c0_33, %c0_34] : memref<8x16x128xbf16, #tpu.memory_space<vmem>>, vector<1x16x128xbf16>
    %48 = vector.shape_cast %47 : vector<1x16x128xbf16> to vector<16x128xbf16>
    %49 = vector.shape_cast %46 : vector<16x128xbf16> to vector<1x16x128xbf16>
    tpu.vector_store %arg9[%c0_32, %c0_33, %c0_34], %49 {strides = array<i32>} : memref<8x16x128xbf16, #tpu.memory_space<vmem>>, vector<1x16x128xbf16>,
    %c1 = arith.constant 1 : index
    %c0_35 = arith.constant 0 : index
    %c0_36 = arith.constant 0 : index
    %50 = vector.load %arg13[%c1, %c0_35, %c0_36] : memref<8x16x128xf32, #tpu.memory_space<vmem>>, vector<1x16x128xf32>
    %51 = vector.shape_cast %50 : vector<1x16x128xf32> to vector<16x128xf32>
    %52 = arith.mulf %44, %51 : vector<16x128xf32>
    %c1_37 = arith.constant 1 : index
    %c0_38 = arith.constant 0 : index
    %c0_39 = arith.constant 0 : index
    %53 = vector.load %arg12[%c1_37, %c0_38, %c0_39] : memref<8x16x128xf32, #tpu.memory_space<vmem>>, vector<1x16x128xf32>
    %54 = vector.shape_cast %53 : vector<1x16x128xf32> to vector<16x128xf32>
    %55 = arith.addf %52, %54 : vector<16x128xf32>
    %56 = math.tanh %55 : vector<16x128xf32>
    %57 = arith.truncf %56 : vector<16x128xf32> to vector<16x128xbf16>
    %c1_40 = arith.constant 1 : index
    %c0_41 = arith.constant 0 : index
    %c0_42 = arith.constant 0 : index
    %58 = vector.load %arg9[%c1_40, %c0_41, %c0_42] : memref<8x16x128xbf16, #tpu.memory_space<vmem>>, vector<1x16x128xbf16>
    %59 = vector.shape_cast %58 : vector<1x16x128xbf16> to vector<16x128xbf16>
    %60 = vector.shape_cast %57 : vector<16x128xbf16> to vector<1x16x128xbf16>
    tpu.vector_store %arg9[%c1_40, %c0_41, %c0_42], %60 {strides = array<i32>} : memref<8x16x128xbf16, #tpu.memory_space<vmem>>, vector<1x16x128xbf16>,
    %c2 = arith.constant 2 : index
    %c0_43 = arith.constant 0 : index
    %c0_44 = arith.constant 0 : index
    %61 = vector.load %arg13[%c2, %c0_43, %c0_44] : memref<8x16x128xf32, #tpu.memory_space<vmem>>, vector<1x16x128xf32>
    %62 = vector.shape_cast %61 : vector<1x16x128xf32> to vector<16x128xf32>
    %63 = arith.mulf %55, %62 : vector<16x128xf32>
    %c2_45 = arith.constant 2 : index
    %c0_46 = arith.constant 0 : index
    %c0_47 = arith.constant 0 : index
    %64 = vector.load %arg12[%c2_45, %c0_46, %c0_47] : memref<8x16x128xf32, #tpu.memory_space<vmem>>, vector<1x16x128xf32>
    %65 = vector.shape_cast %64 : vector<1x16x128xf32> to vector<16x128xf32>
    %66 = arith.addf %63, %65 : vector<16x128xf32>
    %67 = math.tanh %66 : vector<16x128xf32>
    %68 = arith.truncf %67 : vector<16x128xf32> to vector<16x128xbf16>
    %c2_48 = arith.constant 2 : index
    %c0_49 = arith.constant 0 : index
    %c0_50 = arith.constant 0 : index
    %69 = vector.load %arg9[%c2_48, %c0_49, %c0_50] : memref<8x16x128xbf16, #tpu.memory_space<vmem>>, vector<1x16x128xbf16>
    %70 = vector.shape_cast %69 : vector<1x16x128xbf16> to vector<16x128xbf16>
    %71 = vector.shape_cast %68 : vector<16x128xbf16> to vector<1x16x128xbf16>
    tpu.vector_store %arg9[%c2_48, %c0_49, %c0_50], %71 {strides = array<i32>} : memref<8x16x128xbf16, #tpu.memory_space<vmem>>, vector<1x16x128xbf16>,
    %c3 = arith.constant 3 : index
    %c0_51 = arith.constant 0 : index
    %c0_52 = arith.constant 0 : index
    %72 = vector.load %arg13[%c3, %c0_51, %c0_52] : memref<8x16x128xf32, #tpu.memory_space<vmem>>, vector<1x16x128xf32>
    %73 = vector.shape_cast %72 : vector<1x16x128xf32> to vector<16x128xf32>
    %74 = arith.mulf %66, %73 : vector<16x128xf32>
    %c3_53 = arith.constant 3 : index
    %c0_54 = arith.constant 0 : index
    %c0_55 = arith.constant 0 : index
    %75 = vector.load %arg12[%c3_53, %c0_54, %c0_55] : memref<8x16x128xf32, #tpu.memory_space<vmem>>, vector<1x16x128xf32>
    %76 = vector.shape_cast %75 : vector<1x16x128xf32> to vector<16x128xf32>
    %77 = arith.addf %74, %76 : vector<16x128xf32>
    %78 = math.tanh %77 : vector<16x128xf32>
    %79 = arith.truncf %78 : vector<16x128xf32> to vector<16x128xbf16>
    %c3_56 = arith.constant 3 : index
    %c0_57 = arith.constant 0 : index
    %c0_58 = arith.constant 0 : index
    %80 = vector.load %arg9[%c3_56, %c0_57, %c0_58] : memref<8x16x128xbf16, #tpu.memory_space<vmem>>, vector<1x16x128xbf16>
    %81 = vector.shape_cast %80 : vector<1x16x128xbf16> to vector<16x128xbf16>
    %82 = vector.shape_cast %79 : vector<16x128xbf16> to vector<1x16x128xbf16>
    tpu.vector_store %arg9[%c3_56, %c0_57, %c0_58], %82 {strides = array<i32>} : memref<8x16x128xbf16, #tpu.memory_space<vmem>>, vector<1x16x128xbf16>,
    %c4 = arith.constant 4 : index
    %c0_59 = arith.constant 0 : index
    %c0_60 = arith.constant 0 : index
    %83 = vector.load %arg13[%c4, %c0_59, %c0_60] : memref<8x16x128xf32, #tpu.memory_space<vmem>>, vector<1x16x128xf32>
    %84 = vector.shape_cast %83 : vector<1x16x128xf32> to vector<16x128xf32>
    %85 = arith.mulf %77, %84 : vector<16x128xf32>
    %c4_61 = arith.constant 4 : index
    %c0_62 = arith.constant 0 : index
    %c0_63 = arith.constant 0 : index
    %86 = vector.load %arg12[%c4_61, %c0_62, %c0_63] : memref<8x16x128xf32, #tpu.memory_space<vmem>>, vector<1x16x128xf32>
    %87 = vector.shape_cast %86 : vector<1x16x128xf32> to vector<16x128xf32>
    %88 = arith.addf %85, %87 : vector<16x128xf32>
    %89 = math.tanh %88 : vector<16x128xf32>
    %90 = arith.truncf %89 : vector<16x128xf32> to vector<16x128xbf16>
    %c4_64 = arith.constant 4 : index
    %c0_65 = arith.constant 0 : index
    %c0_66 = arith.constant 0 : index
    %91 = vector.load %arg9[%c4_64, %c0_65, %c0_66] : memref<8x16x128xbf16, #tpu.memory_space<vmem>>, vector<1x16x128xbf16>
    %92 = vector.shape_cast %91 : vector<1x16x128xbf16> to vector<16x128xbf16>
    %93 = vector.shape_cast %90 : vector<16x128xbf16> to vector<1x16x128xbf16>
    tpu.vector_store %arg9[%c4_64, %c0_65, %c0_66], %93 {strides = array<i32>} : memref<8x16x128xbf16, #tpu.memory_space<vmem>>, vector<1x16x128xbf16>,
    %c5 = arith.constant 5 : index
    %c0_67 = arith.constant 0 : index
    %c0_68 = arith.constant 0 : index
    %94 = vector.load %arg13[%c5, %c0_67, %c0_68] : memref<8x16x128xf32, #tpu.memory_space<vmem>>, vector<1x16x128xf32>
    %95 = vector.shape_cast %94 : vector<1x16x128xf32> to vector<16x128xf32>
    %96 = arith.mulf %88, %95 : vector<16x128xf32>
    %c5_69 = arith.constant 5 : index
    %c0_70 = arith.constant 0 : index
    %c0_71 = arith.constant 0 : index
    %97 = vector.load %arg12[%c5_69, %c0_70, %c0_71] : memref<8x16x128xf32, #tpu.memory_space<vmem>>, vector<1x16x128xf32>
    %98 = vector.shape_cast %97 : vector<1x16x128xf32> to vector<16x128xf32>
    %99 = arith.addf %96, %98 : vector<16x128xf32>
    %100 = math.tanh %99 : vector<16x128xf32>
    %101 = arith.truncf %100 : vector<16x128xf32> to vector<16x128xbf16>
    %c5_72 = arith.constant 5 : index
    %c0_73 = arith.constant 0 : index
    %c0_74 = arith.constant 0 : index
    %102 = vector.load %arg9[%c5_72, %c0_73, %c0_74] : memref<8x16x128xbf16, #tpu.memory_space<vmem>>, vector<1x16x128xbf16>
    %103 = vector.shape_cast %102 : vector<1x16x128xbf16> to vector<16x128xbf16>
    %104 = vector.shape_cast %101 : vector<16x128xbf16> to vector<1x16x128xbf16>
    tpu.vector_store %arg9[%c5_72, %c0_73, %c0_74], %104 {strides = array<i32>} : memref<8x16x128xbf16, #tpu.memory_space<vmem>>, vector<1x16x128xbf16>,
    %c6 = arith.constant 6 : index
    %c0_75 = arith.constant 0 : index
    %c0_76 = arith.constant 0 : index
    %105 = vector.load %arg13[%c6, %c0_75, %c0_76] : memref<8x16x128xf32, #tpu.memory_space<vmem>>, vector<1x16x128xf32>
    %106 = vector.shape_cast %105 : vector<1x16x128xf32> to vector<16x128xf32>
    %107 = arith.mulf %99, %106 : vector<16x128xf32>
    %c6_77 = arith.constant 6 : index
    %c0_78 = arith.constant 0 : index
    %c0_79 = arith.constant 0 : index
    %108 = vector.load %arg12[%c6_77, %c0_78, %c0_79] : memref<8x16x128xf32, #tpu.memory_space<vmem>>, vector<1x16x128xf32>
    %109 = vector.shape_cast %108 : vector<1x16x128xf32> to vector<16x128xf32>
    %110 = arith.addf %107, %109 : vector<16x128xf32>
    %111 = math.tanh %110 : vector<16x128xf32>
    %112 = arith.truncf %111 : vector<16x128xf32> to vector<16x128xbf16>
    %c6_80 = arith.constant 6 : index
    %c0_81 = arith.constant 0 : index
    %c0_82 = arith.constant 0 : index
    %113 = vector.load %arg9[%c6_80, %c0_81, %c0_82] : memref<8x16x128xbf16, #tpu.memory_space<vmem>>, vector<1x16x128xbf16>
    %114 = vector.shape_cast %113 : vector<1x16x128xbf16> to vector<16x128xbf16>
    %115 = vector.shape_cast %112 : vector<16x128xbf16> to vector<1x16x128xbf16>
    tpu.vector_store %arg9[%c6_80, %c0_81, %c0_82], %115 {strides = array<i32>} : memref<8x16x128xbf16, #tpu.memory_space<vmem>>, vector<1x16x128xbf16>,
    %c7 = arith.constant 7 : index
    %c0_83 = arith.constant 0 : index
    %c0_84 = arith.constant 0 : index
    %116 = vector.load %arg13[%c7, %c0_83, %c0_84] : memref<8x16x128xf32, #tpu.memory_space<vmem>>, vector<1x16x128xf32>
    %117 = vector.shape_cast %116 : vector<1x16x128xf32> to vector<16x128xf32>
    %118 = arith.mulf %110, %117 : vector<16x128xf32>
    %c7_85 = arith.constant 7 : index
    %c0_86 = arith.constant 0 : index
    %c0_87 = arith.constant 0 : index
    %119 = vector.load %arg12[%c7_85, %c0_86, %c0_87] : memref<8x16x128xf32, #tpu.memory_space<vmem>>, vector<1x16x128xf32>
    %120 = vector.shape_cast %119 : vector<1x16x128xf32> to vector<16x128xf32>
    %121 = arith.addf %118, %120 : vector<16x128xf32>
    %122 = math.tanh %121 : vector<16x128xf32>
    %123 = arith.truncf %122 : vector<16x128xf32> to vector<16x128xbf16>
    %c7_88 = arith.constant 7 : index
    %c0_89 = arith.constant 0 : index
    %c0_90 = arith.constant 0 : index
    %124 = vector.load %arg9[%c7_88, %c0_89, %c0_90] : memref<8x16x128xbf16, #tpu.memory_space<vmem>>, vector<1x16x128xbf16>
    %125 = vector.shape_cast %124 : vector<1x16x128xbf16> to vector<16x128xbf16>
    %126 = vector.shape_cast %123 : vector<16x128xbf16> to vector<1x16x128xbf16>
    tpu.vector_store %arg9[%c7_88, %c0_89, %c0_90], %126 {strides = array<i32>} : memref<8x16x128xbf16, #tpu.memory_space<vmem>>, vector<1x16x128xbf16>,
    %c0_91 = arith.constant 0 : index
    %c0_92 = arith.constant 0 : index
    %127 = vector.load %arg10[%c0_91, %c0_92] : memref<16x128xf32, #tpu.memory_space<vmem>>, vector<16x128xf32>
    tpu.vector_store %arg10[%c0_91, %c0_92], %121 {strides = array<i32>} : memref<16x128xf32, #tpu.memory_space<vmem>>, vector<16x128xf32>,
    return
  }
  func.func @transform_0(%arg0: i32, %arg1: i32, %arg2: i32) -> (i32, i32, i32) {
    %c0_i32 = arith.constant 0 : i32
    %c0_i32_0 = arith.constant 0 : i32
    return %arg2, %arg1, %c0_i32 : i32, i32, i32
  }
  func.func @transform_1(%arg0: i32, %arg1: i32, %arg2: i32) -> (i32, i32, i32) {
    %c0_i32 = arith.constant 0 : i32
    %c0_i32_0 = arith.constant 0 : i32
    return %arg2, %arg1, %c0_i32 : i32, i32, i32
  }
  func.func @transform_2(%arg0: i32, %arg1: i32, %arg2: i32) -> (i32, i32) {
    %c0_i32 = arith.constant 0 : i32
    return %arg1, %arg0 : i32, i32
  }
  func.func @transform_3(%arg0: i32, %arg1: i32, %arg2: i32) -> (i32, i32) {
    %c0_i32 = arith.constant 0 : i32
    %c0_i32_0 = arith.constant 0 : i32
    return %c0_i32, %arg0 : i32, i32
  }
  func.func @transform_4(%arg0: i32, %arg1: i32, %arg2: i32) -> (i32, i32) {
    %c0_i32 = arith.constant 0 : i32
    %c0_i32_0 = arith.constant 0 : i32
    return %c0_i32, %arg0 : i32, i32
  }
  func.func @transform_5(%arg0: i32, %arg1: i32, %arg2: i32) -> (i32, i32) {
    %c0_i32 = arith.constant 0 : i32
    %c0_i32_0 = arith.constant 0 : i32
    return %c0_i32, %arg0 : i32, i32
  }
  func.func @transform_6(%arg0: i32, %arg1: i32, %arg2: i32) -> (i32, i32, i32) {
    %c0_i32 = arith.constant 0 : i32
    return %arg2, %arg1, %arg0 : i32, i32, i32
  }
  func.func @transform_7(%arg0: i32, %arg1: i32, %arg2: i32) -> (i32, i32) {
    %c0_i32 = arith.constant 0 : i32
    return %arg1, %arg0 : i32, i32
  }
  func.func @transform_8(%arg0: i32, %arg1: i32, %arg2: i32) -> (i32, i32, i32) {
    %c0_i32 = arith.constant 0 : i32
    return %arg2, %arg1, %arg0 : i32, i32, i32
  }
}

</mosaic_0001>

<bundles_post_ra>
// kernel: _run_seq.1
= control target key start
LH: loop header
LB: loop body
LE: loop exit
PB: predicated region body
PF: predicated region fallthrough
CT: control target
= control target key end

     0   :  { %s2016_s4 = inlined_call_operand.vmem [shape: bf16[128,128], index: 4, kind: input, shape index: {}]   ;;  %s2017_s3 = inlined_call_operand.vmem [shape: bf16[128,128], index: 3, kind: input, shape index: {}]   ;;  %s2018_s1 = inlined_call_operand.vmem [shape: bf16[8,16,128], index: 1, kind: input, shape index: {}]   ;;  %s2019_s0 = inlined_call_operand.vmem [shape: bf16[8,16,128], index: 0, kind: input, shape index: {}]   ;;  %s2020_s5 = inlined_call_operand.vmem [shape: f32[4,128], index: 5, kind: input, shape index: {}]   ;;  %s2021_s2 = inlined_call_operand.vmem [shape: f32[16,128], index: 2, kind: input, shape index: {}, may-alias: {2,7}]   ;;  %s2022_s8 = inlined_call_operand.vmem [shape: bf16[8,16,128], index: 8, kind: output, shape index: {2}]   ;;  %s2023_s6 = inlined_call_operand.vmem [shape: bf16[8,16,128], index: 6, kind: output, shape index: {0}]   ;;  %s2024_s7 = inlined_call_operand.vmem [shape: f32[16,128], index: 7, kind: output, shape index: {1}, may-alias: {2,7}]  }
   0x1   :  { %v1131_v0 = vld [vmem:[%s2016_s4 + $0x38] sm:$0xff]  ;;  %v1130_v1 = vld [vmem:[%s2016_s4 + $0x30] sm:$0xff]  ;;  %v1129_v4 = vld [vmem:[%s2016_s4 + $0x28] sm:$0xff] }
   0x2   :  { %342 = vmatpush.bf16.msra.mxu1 %v1131_v0  ;;  %1234 = vmatpush.bf16.msra.mxu3 %v1131_v0  ;;  %v1123_v2 = vld [vmem:[%s2017_s3 + $0x38] sm:$0xff]  ;;  %v1122_v3 = vld [vmem:[%s2017_s3 + $0x30] sm:$0xff]  ;;  %v1121_v5 = vld [vmem:[%s2017_s3 + $0x28] sm:$0xff] }
   0x3   :  { %180 = vmatpush.bf16.msra.mxu0 %v1123_v2  ;;  %1226 = vmatpush.bf16.msra.mxu2 %v1123_v2  ;;  %v1128_v6 = vld [vmem:[%s2016_s4 + $0x20] sm:$0xff]  ;;  %v1127_v8 = vld [vmem:[%s2016_s4 + $0x18] sm:$0xff]  ;;  %v1126_v10 = vld [vmem:[%s2016_s4 + $0x10] sm:$0xff] }
   0x4   :  { %v1120_v7 = vld [vmem:[%s2017_s3 + $0x20] sm:$0xff]  ;;  %v1119_v9 = vld [vmem:[%s2017_s3 + $0x18] sm:$0xff]  ;;  %v1118_v11 = vld [vmem:[%s2017_s3 + $0x10] sm:$0xff] }
   0x5   :  { %v1125_v12 = vld [vmem:[%s2016_s4 + $0x8] sm:$0xff]  ;;  %v1124_v14 = vld [vmem:[%s2016_s4] sm:$0xff]  ;;  %v1110_v24 = vld [vmem:[%s2018_s1 + $0x10] sm:$0xff] }
   0x6   :  { %343 = vmatpush.bf16.msra.mxu1 %v1130_v1  ;;  %1235 = vmatpush.bf16.msra.mxu3 %v1130_v1  ;;  %v1117_v13 = vld [vmem:[%s2017_s3 + $0x8] sm:$0xff]  ;;  %v1116_v15 = vld [vmem:[%s2017_s3] sm:$0xff]  ;;  %v1114_v25 = vld [vmem:[%s2018_s1 + $0x30] sm:$0xff] }
   0x7   :  { %181 = vmatpush.bf16.msra.mxu0 %v1122_v3  ;;  %1227 = vmatpush.bf16.msra.mxu2 %v1122_v3  ;;  %v1108_v16 = vld [vmem:[%s2018_s1] sm:$0xff]  ;;  %v1109_v20 = vld [vmem:[%s2018_s1 + $0x8] sm:$0xff]  ;;  %v1102_v26 = vld [vmem:[%s2019_s0 + $0x10] sm:$0xff] }
   0x8   :  { %v1112_v17 = vld [vmem:[%s2018_s1 + $0x20] sm:$0xff]  ;;  %v1113_v21 = vld [vmem:[%s2018_s1 + $0x28] sm:$0xff]  ;;  %v1106_v27 = vld [vmem:[%s2019_s0 + $0x30] sm:$0xff] }
   0x9   :  { %v1100_v18 = vld [vmem:[%s2019_s0] sm:$0xff]  ;;  %v1101_v22 = vld [vmem:[%s2019_s0 + $0x8] sm:$0xff]  ;;  %v1111_v28 = vld [vmem:[%s2018_s1 + $0x18] sm:$0xff] }
   0xa   :  { %344 = vmatpush.bf16.msra.mxu1 %v1129_v4  ;;  %1236 = vmatpush.bf16.msra.mxu3 %v1129_v4  ;;  %v1104_v19 = vld [vmem:[%s2019_s0 + $0x20] sm:$0xff]  ;;  %v1105_v23 = vld [vmem:[%s2019_s0 + $0x28] sm:$0xff]  ;;  %v1115_v29 = vld [vmem:[%s2018_s1 + $0x38] sm:$0xff] }
   0xb   :  { %182 = vmatpush.bf16.msra.mxu0 %v1121_v5  ;;  %1228 = vmatpush.bf16.msra.mxu2 %v1121_v5  ;;  %v1103_v30 = vld [vmem:[%s2019_s0 + $0x18] sm:$0xff]  ;;  %v34_v32 = vld [vmem:[%s2020_s5] sm:$0xf] }
   0xc   :  { %v1107_v31 = vld [vmem:[%s2019_s0 + $0x38] sm:$0xff]  ;;  %v1482_v33 = vperm.slane %v34_v32, 1  ;;  %v1494_v60 = vperm.slane %v34_v32, 0  ;;  %v1498_v3 = vperm.slane %v34_v32, 2  ;;  %v1500_v4 = vperm.slane %v34_v32, 3 }
   0xe   :  { %345 = vmatpush.bf16.msra.mxu1 %v1128_v6  ;;  %1237 = vmatpush.bf16.msra.mxu3 %v1128_v6  ;;  %v31_v6 = vld [vmem:[%s2021_s2 + $0x8] sm:$0xff] }
   0xf   :  { %183 = vmatpush.bf16.msra.mxu0 %v1120_v7  ;;  %1229 = vmatpush.bf16.msra.mxu2 %v1120_v7 }
  0x12   :  { %346 = vmatpush.bf16.msra.mxu1 %v1127_v8  ;;  %1238 = vmatpush.bf16.msra.mxu3 %v1127_v8 }
  0x13   :  { %184 = vmatpush.bf16.msra.mxu0 %v1119_v9  ;;  %1230 = vmatpush.bf16.msra.mxu2 %v1119_v9 }
  0x16   :  { %347 = vmatpush.bf16.msra.mxu1 %v1126_v10  ;;  %1239 = vmatpush.bf16.msra.mxu3 %v1126_v10 }
  0x17   :  { %185 = vmatpush.bf16.msra.mxu0 %v1118_v11  ;;  %1231 = vmatpush.bf16.msra.mxu2 %v1118_v11 }
  0x1a   :  { %348 = vmatpush.bf16.msra.mxu1 %v1125_v12  ;;  %1240 = vmatpush.bf16.msra.mxu3 %v1125_v12 }
  0x1b   :  { %186 = vmatpush.bf16.msra.mxu0 %v1117_v13  ;;  %1232 = vmatpush.bf16.msra.mxu2 %v1117_v13 }
  0x1e   :  { %349 = vmatpush.bf16.msra.mxu1 %v1124_v14  ;;  %1241 = vmatpush.bf16.msra.mxu3 %v1124_v14 }
  0x1f   :  { %187 = vmatpush.bf16.msra.mxu0 %v1116_v15  ;;  %1233 = vmatpush.bf16.msra.mxu2 %v1116_v15 }
  0x21   :  { %350 = vmatmul.bf16.vlgmr.msra.gmra.mxu1 %v1108_v16  ;;  %370 = vmatmul.bf16.vlgmr.msra.gmra.mxu3 %v1112_v17 }
  0x22   :  { %188 = vmatmul.bf16.vlgmr.msra.gmra.mxu0 %v1100_v18  ;;  %208 = vmatmul.bf16.vlgmr.msra.gmra.mxu2 %v1104_v19 }
  0x31   :  { %355 = vmatmul.bf16.gmra.mxu1 %v1109_v20  ;;  %375 = vmatmul.bf16.gmra.mxu3 %v1113_v21 }
  0x32   :  { %193 = vmatmul.bf16.gmra.mxu0 %v1101_v22  ;;  %213 = vmatmul.bf16.gmra.mxu2 %v1105_v23 }
  0x41   :  { %360 = vmatmul.bf16.gmra.mxu1 %v1110_v24  ;;  %380 = vmatmul.bf16.gmra.mxu3 %v1114_v25 }
  0x42   :  { %198 = vmatmul.bf16.gmra.mxu0 %v1102_v26  ;;  %218 = vmatmul.bf16.gmra.mxu2 %v1106_v27 }
  0x51   :  { %365 = vmatmul.bf16.gmra.mxu1 %v1111_v28  ;;  %385 = vmatmul.bf16.gmra.mxu3 %v1115_v29 }
  0x52   :  { %203 = vmatmul.bf16.gmra.mxu0 %v1103_v30  ;;  %223 = vmatmul.bf16.gmra.mxu2 %v1107_v31 }
  0x9e   :  { %v351_v34 = vpop.f32.mrf.mxu1 }
  0x9f   :  { %v352_v35 = vadd.f32 %v351_v34, %v1482_v33  ;;  %v189_v36 = vpop.f32.mrf.mxu0 }
  0xa0   :  { %v1503_v5 = vadd.f32 %v189_v36, %v1494_v60 }
  0xa1   :  { %v1070_v37 = vmul.f32 -1.442695, %v352_v35 }
  0xa3   :  { %1242 = vpow2.f32 %v1070_v37  ;;  %v30_v37 = vld [vmem:[%s2021_s2] sm:$0xff] }
  0xa4   :  { %v371_v38 = vpop.f32.mrf.mxu3 }
  0xa5   :  { %v372_v39 = vadd.f32 %v371_v38, %v1482_v33  ;;  %v209_v50 = vpop.f32.mrf.mxu2 }
  0xa6   :  { %v353_v40 = vpop.f32.mrf.mxu1  ;;  %v1520_v17 = vadd.f32 %v209_v50, %v1494_v60 }
  0xa7   :  { %v1078_v41 = vmul.f32 -1.442695, %v372_v39  ;;  %v354_v42 = vadd.f32 %v353_v40, %v1482_v33  ;;  %v191_v43 = vpop.f32.mrf.mxu0 }
  0xa8   :  { %v1510_v8 = vadd.f32 %v191_v43, %v1494_v60 }
  0xa9   :  { %v1243_v44 = vpop.eup %1242  ;;  %1244 = vpow2.f32 %v1078_v41  ;;  %v1071_v45 = vmul.f32 -1.442695, %v354_v42 }
  0xaa   :  { %v439_v46 = vadd.f32 1.0, %v1243_v44 }
  0xab   :  { %1246 = vpow2.f32 %v1071_v45 }
  0xac   :  { %1248 = vrcp.f32 %v439_v46  ;;  %v373_v47 = vpop.f32.mrf.mxu3  ;;  %v464_v61 = vand.u32 2147483647, %v439_v46  ;;  %v466_v0 = vand.u32 2147483648, %v439_v46  ;;  %vm460_vm0 = vweird.f32 %v439_v46 }
  0xad   :  { %v374_v48 = vadd.f32 %v373_v47, %v1482_v33  ;;  %v211_v18 = vpop.f32.mrf.mxu2 }
  0xae   :  { %v356_v49 = vpop.f32.mrf.mxu1  ;;  %vm1505_vm1 = vcmp.eq.f32.partialorder %v464_v61, 8.507059e+37  ;;  %v467_v14 = vor.u32 1.1754944e-38, %v466_v0  ;;  %v1534_v30 = vadd.f32 %v211_v18, %v1494_v60 }
  0xaf   :  { %v1245_v51 = vpop.eup %1244  ;;  %v1079_v52 = vmul.f32 -1.442695, %v374_v48  ;;  %v357_v53 = vadd.f32 %v356_v49, %v1482_v33  ;;  %v194_v57 = vpop.f32.mrf.mxu0 }
  0xb0   :  { %v1489_v54 = vadd.f32 1.0, %v1245_v51  ;;  %v1517_v16 = vadd.f32 %v194_v57, %v1494_v60 }
  0xb1   :  { %v1247_v55 = vpop.eup %1246  ;;  %1250 = vpow2.f32 %v1079_v52  ;;  %v1072_v56 = vmul.f32 -1.442695, %v357_v53 }
  0xb2   :  { %v1249_v58 = vpop.eup %1248  ;;  %1252 = vrcp.f32 %v1489_v54  ;;  %v1492_v59 = vadd.f32 1.0, %v1247_v55  ;;  %v586_v35 = vand.u32 2147483648, %v1489_v54  ;;  %v584_v51 = vand.u32 2147483647, %v1489_v54 }
  0xb3   :  { %v456_v62 = vmul.f32 %v1249_v58, %v439_v46  ;;  %1254 = vpow2.f32 %v1072_v56  ;;  %vm461_vm2 = vweird.f32 %v1249_v58 }
  0xb4   :  { %1256 = vrcp.f32 %v1492_v59  ;;  %v376_v63 = vpop.f32.mrf.mxu3  ;;  %v479_v15 = vand.u32 2147483647, %v1492_v59  ;;  %vm462_vm3 = vmor %vm460_vm0, %vm461_vm2  ;;  %vm475_vm4 = vweird.f32 %v1492_v59  ;;  %v481_v26 = vand.u32 2147483648, %v1492_v59 }
  0xb5   :  { %v457_v1 = vsub.f32 1.0, %v456_v62  ;;  %v377_v2 = vadd.f32 %v376_v63, %v1482_v33  ;;  %v1560_v56 = vor.u32 1.1754944e-38, %v586_v35  ;;  %vm580_vm2 = vweird.f32 %v1489_v54 }
  0xb6   :  { %v358_v7 = vpop.f32.mrf.mxu1  ;;  %vm1539_vm5 = vcmp.eq.f32.partialorder %v479_v15, 8.507059e+37  ;;  %v482_v41 = vor.u32 1.1754944e-38, %v481_v26 }
  0xb7   :  { %v1251_v9 = vpop.eup %1250  ;;  %v1080_v10 = vmul.f32 -1.442695, %v377_v2  ;;  %v458_v11 = vmul.f32 %v1249_v58, %v457_v1  ;;  %v359_v12 = vadd.f32 %v358_v7, %v1482_v33  ;;  %v196_v29 = vpop.f32.mrf.mxu0 }
  0xb8   :  { %v1513_v13 = vpop.eup %1252  ;;  %v1522_v20 = vadd.f32 1.0, %v1251_v9  ;;  %v1558_v55 = vadd.f32 %v196_v29, %v1494_v60 }
  0xb9   :  { %v1255_v19 = vpop.eup %1254  ;;  %1258 = vpow2.f32 %v1080_v10  ;;  %v459_v21 = vadd.f32 %v1249_v58, %v458_v11  ;;  %v1073_v22 = vmul.f32 -1.442695, %v359_v12  ;;  %v576_v24 = vmul.f32 %v1513_v13, %v1489_v54 }
  0xba   :  { %v1257_v23 = vpop.eup %1256  ;;  %v1526_v25 = vadd.f32 1.0, %v1255_v19 }
  0xbb   :  { %v471_v27 = vmul.f32 %v1257_v23, %v1492_v59  ;;  %v463_v28 = vsel %vm462_vm3, %v1249_v58, %v459_v21  ;;  %1260 = vpow2.f32 %v1073_v22  ;;  %v577_v39 = vsub.f32 1.0, %v576_v24 }
  0xbc   :  { %1262 = vrcp.f32 %v1526_v25  ;;  %v468_v31 = vsel %vm1505_vm1, %v467_v14, %v463_v28  ;;  %v378_v32 = vpop.f32.mrf.mxu3  ;;  %vm476_vm7 = vweird.f32 %v1257_v23  ;;  %v494_v46 = vand.u32 2147483647, %v1526_v25 }
  0xbd   :  { %v472_v36 = vsub.f32 1.0, %v471_v27  ;;  %1264 = vrcp.f32 %v1522_v20  ;;  %vm744_vm6 = vcmp.gt.f32.partialorder %v468_v31, %v1498_v3  ;;  %v379_v38 = vadd.f32 %v378_v32, %v1482_v33  ;;  %vm477_vm8 = vmor %vm475_vm4, %vm476_vm7 }
  0xbe   :  { %v761_v40 = vsel %vm744_vm6, %v1500_v4, 0.0  ;;  %v361_v42 = vpop.f32.mrf.mxu1  ;;  %v496_v47 = vand.u32 2147483648, %v1526_v25  ;;  %vm490_vm9 = vweird.f32 %v1526_v25  ;;  %v578_v61 = vmul.f32 %v1513_v13, %v577_v39 }
  0xbf   :  { %v1259_v43 = vpop.eup %1258  ;;  %v1081_v44 = vmul.f32 -1.442695, %v379_v38  ;;  %v473_v45 = vmul.f32 %v1257_v23, %v472_v36  ;;  %v797_v49 = vmul.f32 %v761_v40, %v30_v37  ;;  %v362_v50 = vadd.f32 %v361_v42, %v1482_v33  ;;  %v199_v15 = vpop.f32.mrf.mxu0 }
  0xc0   :  { %v1553_v48 = vadd.f32 1.0, %v1259_v43  ;;  %vm1573_vm10 = vcmp.eq.f32.partialorder %v494_v46, 8.507059e+37  ;;  %v497_v2 = vor.u32 1.1754944e-38, %v496_v47  ;;  %vm581_vm3 = vweird.f32 %v1513_v13 }
  0xc1   :  { %v1261_v52 = vpop.eup %1260  ;;  %1266 = vpow2.f32 %v1081_v44  ;;  %v474_v53 = vadd.f32 %v1257_v23, %v473_v45  ;;  %v801_v59 = vadd.f32 %v797_v49, %v1503_v5  ;;  %v1074_v9 = vmul.f32 -1.442695, %v362_v50 }
  0xc2   :  { %v1263_v57 = vpop.eup %1262  ;;  %1268 = vrcp.f32 %v1553_v48  ;;  %v1563_v58 = vadd.f32 1.0, %v1261_v52  ;;  %v616_v38 = vand.u32 2147483648, %v1553_v48  ;;  %vm1677_vm7 = vcmp.eq.f32.partialorder %v584_v51, 8.507059e+37 }
  0xc3   :  { %v1570_v62 = vpop.eup %1264  ;;  %v486_v63 = vmul.f32 %v1263_v57, %v1526_v25  ;;  %v478_v0 = vsel %vm477_vm8, %v1257_v23, %v474_v53  ;;  %vm491_vm12 = vweird.f32 %v1263_v57 }
  0xc4   :  { %1270 = vrcp.f32 %v1563_v58  ;;  %v483_v7 = vsel %vm1539_vm5, %v482_v41, %v478_v0  ;;  %v381_v10 = vpop.f32.mrf.mxu3  ;;  %v1588_v18 = vmul.f32 %v1570_v62, %v1522_v20  ;;  %v509_v29 = vand.u32 2147483647, %v1563_v58  ;;  %vm492_vm13 = vmor %vm490_vm9, %vm491_vm12  ;;  %v214_v41 = vpop.f32.mrf.mxu2 }
  0xc5   :  { %v487_v11 = vsub.f32 1.0, %v486_v63  ;;  %v1135_v12 = vpack.c.bf16 %v483_v7, %v468_v31  ;;  %vm745_vm11 = vcmp.gt.f32.partialorder %v483_v7, %v1498_v3  ;;  %v382_v14 = vadd.f32 %v381_v10, %v1482_v33 }
  0xc6   :  { %v762_v5 = vsel %vm745_vm11, %v1500_v4, 0.0  ;;  %1272 = vpow2.f32 %v1074_v9  ;;  %v363_v19 = vpop.f32.mrf.mxu1  ;;  %v1601_v31 = vadd.f32 %v1513_v13, %v578_v61  ;;  %v592_v37 = vsub.f32 1.0, %v1588_v18  ;;  %vm1711_vm11 = vmor %vm580_vm2, %vm581_vm3 }
  0xc7   :  { %v1267_v21 = vpop.eup %1266  ;;  %1136 = vst [vmem:[%s2022_s8] sm:$0xff] %v1135_v12   ;;  %v798_v22 = vmul.f32 %v762_v5, %v31_v6  ;;  %v1082_v23 = vmul.f32 -1.442695, %v382_v14  ;;  %v488_v24 = vmul.f32 %v1263_v57, %v487_v11  ;;  %v364_v26 = vadd.f32 %v363_v19, %v1482_v33  ;;  %v201_v6 = vpop.f32.mrf.mxu0 }
  0xc8   :  { %v1595_v27 = vpop.eup %1268  ;;  %1274 = vtanh.f32 %v801_v59  ;;  %v1597_v28 = vadd.f32 1.0, %v1267_v21  ;;  %vm505_vm14 = vweird.f32 %v1563_v58  ;;  %vm1621_vm15 = vcmp.eq.f32.partialorder %v509_v29, 8.507059e+37 }
  0xc9   :  { %v606_v32 = vmul.f32 %v1595_v27, %v1553_v48  ;;  %v1606_v34 = vadd.f32 %v798_v22, %v1510_v8  ;;  %1276 = vpow2.f32 %v1082_v23  ;;  %v489_v35 = vadd.f32 %v1263_v57, %v488_v24 }
  0xca   :  { %v1271_v36 = vpop.eup %1270  ;;  %1278 = vrcp.f32 %v1597_v28  ;;  %v1075_v39 = vmul.f32 -1.442695, %v364_v26  ;;  %v511_v25 = vand.u32 2147483648, %v1563_v58  ;;  %v1633_v61 = vadd.f32 %v199_v15, %v1494_v60 }
  0xcb   :  { %v501_v40 = vmul.f32 %v1271_v36, %v1563_v58  ;;  %1280 = vtanh.f32 %v1606_v34  ;;  %v493_v8 = vsel %vm492_vm13, %v1263_v57, %v489_v35  ;;  %v607_v46 = vsub.f32 1.0, %v606_v32 }
  0xcc   :  { %v1273_v42 = vpop.eup %1272  ;;  %v1619_v43 = vsel %vm1573_vm10, %v497_v2, %v493_v8  ;;  %1282 = vpow2.f32 %v1075_v39  ;;  %v383_v44 = vpop.f32.mrf.mxu3  ;;  %vm506_vm1 = vweird.f32 %v1271_v36  ;;  %v631_v9 = vand.u32 2147483648, %v1597_v28 }
  0xcd   :  { %v502_v47 = vsub.f32 1.0, %v501_v40  ;;  %v1626_v49 = vadd.f32 1.0, %v1273_v42  ;;  %vm746_vm0 = vcmp.gt.f32.partialorder %v1619_v43, %v1498_v3  ;;  %v384_v53 = vadd.f32 %v383_v44, %v1482_v33  ;;  %vm507_vm4 = vmor %vm505_vm14, %vm506_vm1 }
  0xce   :  { %v1275_v50 = vpop.eup %1274  ;;  %v763_v52 = vsel %vm746_vm0, %v1500_v4, 0.0  ;;  %v366_v57 = vpop.f32.mrf.mxu1  ;;  %v512_v12 = vor.u32 1.1754944e-38, %v511_v25  ;;  %v1645_v15 = vmul.f32 %v1595_v27, %v607_v46  ;;  %v1650_v19 = vadd.f32 %v214_v41, %v1494_v60 }
  0xcf   :  { %v1277_v63 = vpop.eup %1276  ;;  %1284 = vrcp.f32 %v1626_v49  ;;  %v812_v0 = vmul.f32 %v801_v59, %v763_v52  ;;  %v503_v1 = vmul.f32 %v1271_v36, %v502_v47  ;;  %v367_v2 = vadd.f32 %v366_v57, %v1482_v33 }
  0xd0   :  { %v1639_v7 = vpop.eup %1278  ;;  %v1642_v10 = vadd.f32 1.0, %v1277_v63  ;;  %v1083_v11 = vmul.f32 -1.442695, %v384_v53  ;;  %v524_v24 = vand.u32 2147483647, %v1626_v49  ;;  %v1657_v26 = vadd.f32 %v201_v6, %v1494_v60 }
  0xd1   :  { %v1281_v14 = vpop.eup %1280  ;;  %v621_v59 = vmul.f32 %v1639_v7, %v1597_v28  ;;  %v504_v5 = vadd.f32 %v1271_v36, %v503_v1  ;;  %v1076_v23 = vmul.f32 -1.442695, %v367_v2  ;;  %v1661_v29 = vadd.f32 %v812_v0, %v1517_v16 }
  0xd2   :  { %v1283_v21 = vpop.eup %1282  ;;  %v1175_v22 = vpack.c.bf16 %v1281_v14, %v1275_v50  ;;  %1286 = vrcp.f32 %v1642_v10  ;;  %vm520_vm5 = vweird.f32 %v1626_v49  ;;  %v526_v40 = vand.u32 2147483648, %v1626_v49 }
  0xd3   :  { %v1663_v32 = vadd.f32 1.0, %v1283_v21  ;;  %v508_v35 = vsel %vm507_vm4, %v1271_v36, %v504_v5  ;;  %1288 = vpow2.f32 %v1083_v11  ;;  %v622_v41 = vsub.f32 1.0, %v621_v59  ;;  %v216_v36 = vpop.f32.mrf.mxu2 }
  0xd4   :  { %1176 = vst [vmem:[%s2023_s6] sm:$0xff] %v1175_v22   ;;  %v513_v58 = vsel %vm1621_vm15, %v512_v12, %v508_v35  ;;  %v386_v39 = vpop.f32.mrf.mxu3  ;;  %vm1689_vm8 = vcmp.eq.f32.partialorder %v524_v24, 8.507059e+37  ;;  %v527_v53 = vor.u32 1.1754944e-38, %v526_v40  ;;  %v1695_v57 = vadd.f32 %v216_v36, %v1494_v60  ;;  %v204_v35 = vpop.f32.mrf.mxu0 }
  0xd5   :  { %v1285_v8 = vpop.eup %1284  ;;  %1290 = vrcp.f32 %v1663_v32  ;;  %v1140_v16 = vpack.c.bf16 %v513_v58, %v1619_v43  ;;  %vm747_vm6 = vcmp.gt.f32.partialorder %v513_v58, %v1498_v3  ;;  %v387_v25 = vadd.f32 %v386_v39, %v1482_v33 }
  0xd6   :  { %v516_v44 = vmul.f32 %v1285_v8, %v1626_v49  ;;  %v764_v45 = vsel %vm747_vm6, %v1500_v4, 0.0  ;;  %1292 = vpow2.f32 %v1076_v23  ;;  %v368_v46 = vpop.f32.mrf.mxu1  ;;  %v1700_v0 = vmul.f32 %v1639_v7, %v622_v41 }
  0xd7   :  { %1294 = vtanh.f32 %v1661_v29  ;;  %1212 = vst [vmem:[%s2022_s8 + $0x8] sm:$0xff] %v1140_v16   ;;  %v813_v43 = vmul.f32 %v1606_v34, %v764_v45  ;;  %v369_v47 = vadd.f32 %v368_v46, %v1482_v33  ;;  %v1084_v52 = vmul.f32 -1.442695, %v387_v25 }
  0xd8   :  { %v517_v50 = vsub.f32 1.0, %v516_v44  ;;  %v1697_v63 = vpop.eup %1286  ;;  %vm521_vm9 = vweird.f32 %v1285_v8  ;;  %vm535_vm10 = vweird.f32 %v1663_v32  ;;  %v539_v11 = vand.u32 2147483647, %v1663_v32 }
  0xd9   :  { %v1703_v1 = vadd.f32 %v813_v43, %v1558_v55  ;;  %v1077_v34 = vmul.f32 -1.442695, %v369_v47  ;;  %v1289_v2 = vpop.eup %1288  ;;  %1296 = vpow2.f32 %v1084_v52  ;;  %vm610_vm12 = vweird.f32 %v1553_v48  ;;  %vm522_vm13 = vmor %vm520_vm5, %vm521_vm9 }
  0xda   :  { %v518_v6 = vmul.f32 %v1285_v8, %v517_v50  ;;  %v1716_v55 = vadd.f32 1.0, %v1289_v2  ;;  %v541_v59 = vand.u32 2147483648, %v1663_v32  ;;  %v583_v5 = vsel %vm1711_vm11, %v1513_v13, %v1601_v31 }
  0xdb   :  { %v1291_v14 = vpop.eup %1290  ;;  %1298 = vtanh.f32 %v1703_v1  ;;  %v1726_v54 = vmul.f32 %v1697_v63, %v1642_v10  ;;  %v1737_v31 = vadd.f32 %v204_v35, %v1494_v60  ;;  %vm1739_vm14 = vcmp.eq.f32.partialorder %v539_v11, 8.507059e+37 }
  0xdc   :  { %v1293_v21 = vpop.eup %1292  ;;  %v531_v22 = vmul.f32 %v1291_v14, %v1663_v32  ;;  %v519_v23 = vadd.f32 %v1285_v8, %v518_v6  ;;  %1300 = vpow2.f32 %v1077_v34  ;;  %v388_v24 = vpop.f32.mrf.mxu3  ;;  %v1746_v36 = vsel %vm1677_vm7, %v1560_v56, %v583_v5 }
  0xdd   :  { %v1295_v58 = vpop.eup %1294  ;;  %1302 = vrcp.f32 %v1716_v55  ;;  %v1730_v39 = vadd.f32 1.0, %v1293_v21  ;;  %v389_v13 = vadd.f32 %v388_v24, %v1482_v33  ;;  %v542_v44 = vor.u32 1.1754944e-38, %v541_v59 }
  0xde   :  { %v532_v40 = vsub.f32 1.0, %v531_v22  ;;  %v523_v41 = vsel %vm522_vm13, %v1285_v8, %v519_v23  ;;  %v637_v25 = vsub.f32 1.0, %v1726_v54  ;;  %vm536_vm0 = vweird.f32 %v1291_v14 }
  0xdf   :  { %1304 = vrcp.f32 %v1730_v39  ;;  %v528_v49 = vsel %vm1689_vm8, %v527_v53, %v523_v41  ;;  %v1085_v33 = vmul.f32 -1.442695, %v389_v13  ;;  %v1297_v45 = vpop.eup %1296  ;;  %vm752_vm1 = vcmp.gt.f32.partialorder %v1746_v36, %v1498_v3  ;;  %v219_v53 = vpop.f32.mrf.mxu2  ;;  %vm537_vm2 = vmor %vm535_vm10, %vm536_vm0 }
  0xe0   :  { %vm748_vm15 = vcmp.gt.f32.partialorder %v528_v49, %v1498_v3  ;;  %v533_v8 = vmul.f32 %v1291_v14, %v532_v40  ;;  %v1753_v43 = vadd.f32 1.0, %v1297_v45  ;;  %v554_v52 = vand.u32 2147483647, %v1730_v39 }
  0xe1   :  { %v1299_v46 = vpop.eup %1298  ;;  %v765_v56 = vsel %vm748_vm15, %v1500_v4, 0.0  ;;  %1306 = vpow2.f32 %v1085_v33  ;;  %v1769_v6 = vadd.f32 %v219_v53, %v1494_v60  ;;  %vm550_vm3 = vweird.f32 %v1730_v39 }
  0xe2   :  { %v1301_v42 = vpop.eup %1300  ;;  %v1180_v51 = vpack.c.bf16 %v1299_v46, %v1295_v58  ;;  %v829_v47 = vmul.f32 %v1661_v29, %v765_v56  ;;  %v534_v50 = vadd.f32 %v1291_v14, %v533_v8  ;;  %1308 = vrcp.f32 %v1753_v43 }
  0xe3   :  { %v1760_v34 = vpop.eup %1302  ;;  %v1763_v2 = vadd.f32 1.0, %v1301_v42  ;;  %v609_v29 = vadd.f32 %v1595_v27, %v1645_v15  ;;  %v556_v12 = vand.u32 2147483648, %v1730_v39  ;;  %vm611_vm4 = vweird.f32 %v1595_v27 }
  0xe4   :  { %1219 = vst [vmem:[%s2023_s6 + $0x8] sm:$0xff] %v1180_v51   ;;  %v538_v11 = vsel %vm537_vm2, %v1291_v14, %v534_v50  ;;  %v1786_v15 = vsel %vm752_vm1, %v1500_v4, 0.0  ;;  %v614_v14 = vand.u32 2147483647, %v1553_v48  ;;  %v1791_v5 = vmul.f32 %v1760_v34, %v1716_v55  ;;  %vm612_vm6 = vmor %vm610_vm12, %vm611_vm4 }
  0xe5   :  { %v1305_v59 = vpop.eup %1304  ;;  %1310 = vrcp.f32 %v1763_v2  ;;  %v543_v32 = vsel %vm1739_vm14, %v542_v44, %v538_v11  ;;  %v834_v54 = vadd.f32 %v829_v47, %v1633_v61  ;;  %vm1795_vm5 = vcmp.eq.f32.partialorder %v554_v52, 8.507059e+37  ;;  %v206_v52 = vpop.f32.mrf.mxu0 }
  0xe6   :  { %v546_v21 = vmul.f32 %v1305_v59, %v1730_v39  ;;  %v1145_v22 = vpack.c.bf16 %v543_v32, %v528_v49  ;;  %vm749_vm7 = vcmp.gt.f32.partialorder %v543_v32, %v1498_v3  ;;  %vm551_vm8 = vweird.f32 %v1305_v59 }
  0xe7   :  { %v1307_v24 = vpop.eup %1306  ;;  %v613_v35 = vsel %vm612_vm6, %v1595_v27, %v609_v29  ;;  %v617_v58 = vor.u32 1.1754944e-38, %v616_v38  ;;  %v766_v61 = vsel %vm749_vm7, %v1500_v4, 0.0  ;;  %vm615_vm9 = vcmp.eq.f32.partialorder %v614_v14, 8.507059e+37  ;;  %vm552_vm12 = vmor %vm550_vm3, %vm551_vm8 }
  0xe8   :  { %v547_v13 = vsub.f32 1.0, %v546_v21  ;;  %v1805_v40 = vadd.f32 1.0, %v1307_v24  ;;  %1213 = vst [vmem:[%s2022_s8 + $0x10] sm:$0xff] %v1145_v22   ;;  %v1811_v41 = vpop.eup %1308  ;;  %v830_v16 = vmul.f32 %v1703_v1, %v766_v61  ;;  %v638_v27 = vmul.f32 %v1697_v63, %v637_v25 }
  0xe9   :  { %v1814_v49 = vsel %vm615_vm9, %v617_v58, %v613_v35  ;;  %vm640_vm10 = vweird.f32 %v1642_v10  ;;  %v1820_v48 = vmul.f32 %v1811_v41, %v1753_v43  ;;  %vm641_vm11 = vweird.f32 %v1697_v63 }
  0xea   :  { %v548_v38 = vmul.f32 %v1305_v59, %v547_v13  ;;  %v644_v33 = vand.u32 2147483647, %v1642_v10  ;;  %1312 = vtanh.f32 %v834_v54  ;;  %v1825_v45 = vadd.f32 %v830_v16, %v1657_v26  ;;  %vm1843_vm14 = vmor %vm640_vm10, %vm641_vm11 }
  0xeb   :  { %v1311_v44 = vpop.eup %1310  ;;  %v639_v1 = vadd.f32 %v1697_v63, %v638_v27  ;;  %v646_v25 = vand.u32 2147483648, %v1642_v10  ;;  %1314 = vrcp.f32 %v1805_v40  ;;  %vm754_vm13 = vcmp.gt.f32.partialorder %v1814_v49, %v1498_v3 }
  0xec   :  { %v561_v8 = vmul.f32 %v1311_v44, %v1763_v2  ;;  %v549_v46 = vadd.f32 %v1305_v59, %v548_v38  ;;  %v652_v56 = vsub.f32 1.0, %v1791_v5  ;;  %v667_v26 = vsub.f32 1.0, %v1820_v48 }
  0xed   :  { %1316 = vtanh.f32 %v1825_v45  ;;  %v557_v42 = vor.u32 1.1754944e-38, %v556_v12  ;;  %v643_v50 = vsel %vm1843_vm14, %v1697_v63, %v639_v1  ;;  %vm645_vm15 = vcmp.eq.f32.partialorder %v644_v33, 8.507059e+37 }
  0xee   :  { %v562_v39 = vsub.f32 1.0, %v561_v8  ;;  %v553_v47 = vsel %vm552_vm12, %v1305_v59, %v549_v46  ;;  %vm625_vm0 = vweird.f32 %v1597_v28  ;;  %v647_v29 = vor.u32 1.1754944e-38, %v646_v25  ;;  %v1891_v8 = vpop.f32.mrf.mxu2 }
  0xef   :  { %v558_v53 = vsel %vm1795_vm5, %v557_v42, %v553_v47  ;;  %v771_v10 = vsel %vm754_vm13, %v1500_v4, 0.0  ;;  %v569_v11 = vand.u32 2147483647, %v1763_v2  ;;  %vm566_vm2 = vweird.f32 %v1311_v44 }
  0xf0   :  { %vm750_vm1 = vcmp.gt.f32.partialorder %v558_v53, %v1498_v3  ;;  %v563_v12 = vmul.f32 %v1311_v44, %v562_v39  ;;  %v571_v59 = vand.u32 2147483648, %v1763_v2  ;;  %v1313_v32 = vpop.eup %1312  ;;  %v1858_v14 = vsel %vm645_vm15, %v647_v29, %v643_v50 }
  0xf1   :  { %v767_v63 = vsel %vm750_vm1, %v1500_v4, 0.0  ;;  %v207_v21 = vadd.f32 %v206_v52, %v1494_v60  ;;  %vm565_vm3 = vweird.f32 %v1763_v2  ;;  %v1862_v22 = vpop.eup %1314  ;;  %vm570_vm4 = vcmp.eq.f32.partialorder %v569_v11, 8.507059e+37 }
  0xf2   :  { %v846_v23 = vmul.f32 %v834_v54, %v767_v63  ;;  %v564_v24 = vadd.f32 %v1311_v44, %v563_v12  ;;  %v593_v35 = vmul.f32 %v1570_v62, %v592_v37  ;;  %vm567_vm5 = vmor %vm565_vm3, %vm566_vm2  ;;  %v572_v13 = vor.u32 1.1754944e-38, %v571_v59 }
  0xf3   :  { %v1317_v58 = vpop.eup %1316  ;;  %vm595_vm6 = vweird.f32 %v1522_v20  ;;  %vm596_vm7 = vweird.f32 %v1570_v62  ;;  %v599_v61 = vand.u32 2147483647, %v1522_v20  ;;  %v1874_v18 = vmul.f32 %v1862_v22, %v1805_v40 }
  0xf4   :  { %v1185_v16 = vpack.c.bf16 %v1317_v58, %v1313_v32  ;;  %v851_v2 = vadd.f32 %v846_v23, %v1737_v31  ;;  %v568_v27 = vsel %vm567_vm5, %v1311_v44, %v564_v24  ;;  %v594_v54 = vadd.f32 %v1570_v62, %v593_v35  ;;  %vm1878_vm9 = vmor %vm595_vm6, %vm596_vm7 }
  0xf5   :  { %vm756_vm8 = vcmp.gt.f32.partialorder %v1858_v14, %v1498_v3  ;;  %v573_v37 = vsel %vm570_vm4, %v572_v13, %v568_v27  ;;  %v601_v33 = vand.u32 2147483648, %v1522_v20  ;;  %vm600_vm10 = vcmp.eq.f32.partialorder %v599_v61, 8.507059e+37 }
  0xf6   :  { %1220 = vst [vmem:[%s2023_s6 + $0x10] sm:$0xff] %v1185_v16   ;;  %v863_v31 = vmul.f32 %v851_v2, %v1786_v15  ;;  %v598_v44 = vsel %vm1878_vm9, %v1570_v62, %v594_v54  ;;  %v1150_v1 = vpack.c.bf16 %v573_v37, %v558_v53  ;;  %vm751_vm11 = vcmp.gt.f32.partialorder %v573_v37, %v1498_v3  ;;  %v224_v24 = vpop.f32.mrf.mxu2 }
  0xf7   :  { %v602_v25 = vor.u32 1.1754944e-38, %v601_v33  ;;  %v624_v20 = vadd.f32 %v1639_v7, %v1700_v0  ;;  %vm626_vm12 = vweird.f32 %v1639_v7  ;;  %1318 = vtanh.f32 %v851_v2 }
  0xf8   :  { %v868_v46 = vadd.f32 %v863_v31, %v1520_v17  ;;  %1214 = vst [vmem:[%s2022_s8 + $0x18] sm:$0xff] %v1150_v1   ;;  %v768_v62 = vsel %vm751_vm11, %v1500_v4, 0.0  ;;  %vm1903_vm13 = vmor %vm625_vm0, %vm626_vm12  ;;  %v629_v42 = vand.u32 2147483647, %v1597_v28  ;;  %v653_v39 = vmul.f32 %v1760_v34, %v652_v56 }
  0xf9   :  { %v603_v0 = vsel %vm600_vm10, %v602_v25, %v598_v44  ;;  %v847_v51 = vmul.f32 %v1825_v45, %v768_v62  ;;  %v628_v17 = vsel %vm1903_vm13, %v1639_v7, %v624_v20  ;;  %v632_v52 = vor.u32 1.1754944e-38, %v631_v9 }
  0xfa   :  { %v880_v47 = vmul.f32 %v868_v46, %v771_v10  ;;  %v1155_v50 = vpack.c.bf16 %v603_v0, %v1746_v36  ;;  %vm753_vm14 = vcmp.gt.f32.partialorder %v603_v0, %v1498_v3  ;;  %vm630_vm15 = vcmp.eq.f32.partialorder %v629_v42, 8.507059e+37 }
  0xfb   :  { %v770_v53 = vsel %vm753_vm14, %v1500_v4, 0.0  ;;  %v852_v29 = vadd.f32 %v847_v51, %v207_v21  ;;  %v654_v45 = vadd.f32 %v1760_v34, %v653_v39  ;;  %v633_v5 = vsel %vm630_vm15, %v632_v52, %v628_v17 }
  0xfc   :  { %v885_v7 = vadd.f32 %v880_v47, %v1650_v19  ;;  %1215 = vst [vmem:[%s2022_s8 + $0x20] sm:$0xff] %v1155_v50   ;;  %vm655_vm0 = vweird.f32 %v1716_v55  ;;  %vm656_vm1 = vweird.f32 %v1760_v34  ;;  %v659_v36 = vand.u32 2147483647, %v1716_v55 }
  0xfd   :  { %1320 = vtanh.f32 %v852_v29  ;;  %v864_v28 = vmul.f32 %v852_v29, %v770_v53  ;;  %vm1927_vm2 = vmor %vm655_vm0, %vm656_vm1  ;;  %v661_v56 = vand.u32 2147483648, %v1716_v55  ;;  %v1319_v19 = vpop.eup %1318  ;;  %v682_v10 = vsub.f32 1.0, %v1874_v18 }
  0xfe   :  { %v773_v11 = vsel %vm756_vm8, %v1500_v4, 0.0  ;;  %v658_v12 = vsel %vm1927_vm2, %v1760_v34, %v654_v45  ;;  %v1160_v59 = vpack.c.bf16 %v633_v5, %v1814_v49  ;;  %vm755_vm3 = vcmp.gt.f32.partialorder %v633_v5, %v1498_v3  ;;  %v226_v0 = vpop.f32.mrf.mxu2 }
  0xff   :  { %v897_v32 = vmul.f32 %v885_v7, %v773_v11  ;;  %v869_v63 = vadd.f32 %v864_v28, %v1534_v30  ;;  %v662_v21 = vor.u32 1.1754944e-38, %v661_v56  ;;  %1322 = vtanh.f32 %v868_v46 }
 0x100   :  { %vm660_vm4 = vcmp.eq.f32.partialorder %v659_v36, 8.507059e+37  ;;  %1216 = vst [vmem:[%s2022_s8 + $0x28] sm:$0xff] %v1160_v59   ;;  %v772_v55 = vsel %vm755_vm3, %v1500_v4, 0.0  ;;  %v668_v34 = vmul.f32 %v1811_v41, %v667_v26  ;;  %vm670_vm5 = vweird.f32 %v1753_v43 }
 0x101   :  { %1324 = vtanh.f32 %v869_v63  ;;  %v663_v49 = vsel %vm660_vm4, %v662_v21, %v658_v12  ;;  %v881_v23 = vmul.f32 %v869_v63, %v772_v55  ;;  %v902_v13 = vadd.f32 %v897_v32, %v1769_v6 }
 0x102   :  { %1326 = vtanh.f32 %v885_v7  ;;  %v1165_v30 = vpack.c.bf16 %v663_v49, %v1858_v14  ;;  %vm757_vm6 = vcmp.gt.f32.partialorder %v663_v49, %v1498_v3  ;;  %v669_v35 = vadd.f32 %v1811_v41, %v668_v34 }
 0x103   :  { %v1321_v58 = vpop.eup %1320  ;;  %v886_v48 = vadd.f32 %v881_v23, %v1695_v57  ;;  %vm671_vm7 = vweird.f32 %v1811_v41  ;;  %v674_v26 = vand.u32 2147483647, %v1753_v43  ;;  %v774_v14 = vsel %vm757_vm6, %v1500_v4, 0.0 }
 0x104   :  { %v1190_v61 = vpack.c.bf16 %v1321_v58, %v1319_v19  ;;  %1217 = vst [vmem:[%s2022_s8 + $0x30] sm:$0xff] %v1165_v30   ;;  %vm1963_vm8 = vmor %vm670_vm5, %vm671_vm7  ;;  %v676_v2 = vand.u32 2147483648, %v1753_v43  ;;  %v683_v6 = vmul.f32 %v1862_v22, %v682_v10  ;;  %v222_v57 = vadd.f32 %v1891_v8, %v1494_v60 }
 0x105   :  { %1328 = vtanh.f32 %v886_v48  ;;  %v898_v27 = vmul.f32 %v886_v48, %v774_v14  ;;  %v673_v54 = vsel %vm1963_vm8, %v1811_v41, %v669_v35  ;;  %v1323_v18 = vpop.eup %1322  ;;  %vm685_vm9 = vweird.f32 %v1805_v40 }
 0x106   :  { %1221 = vst [vmem:[%s2023_s6 + $0x18] sm:$0xff] %v1190_v61   ;;  %v677_v37 = vor.u32 1.1754944e-38, %v676_v2  ;;  %v684_v38 = vadd.f32 %v1862_v22, %v683_v6  ;;  %vm686_vm10 = vweird.f32 %v1862_v22  ;;  %vm675_vm11 = vcmp.eq.f32.partialorder %v674_v26, 8.507059e+37 }
 0x107   :  { %v1325_v43 = vpop.eup %1324  ;;  %v903_v33 = vadd.f32 %v898_v27, %v222_v57  ;;  %vm1980_vm12 = vmor %vm685_vm9, %vm686_vm10  ;;  %v689_v41 = vand.u32 2147483647, %v1805_v40  ;;  %v691_v44 = vand.u32 2147483648, %v1805_v40  ;;  %1330 = vtanh.f32 %v902_v13 }
 0x108   :  { %v1327_v1 = vpop.eup %1326  ;;  %v1195_v25 = vpack.c.bf16 %v1325_v43, %v1323_v18  ;;  %v678_v8 = vsel %vm675_vm11, %v677_v37, %v673_v54  ;;  %v688_v20 = vsel %vm1980_vm12, %v1862_v22, %v684_v38  ;;  %v225_v46 = vadd.f32 %v224_v24, %v1494_v60 }
 0x109   :  { %1332 = vtanh.f32 %v903_v33  ;;  %vm758_vm13 = vcmp.gt.f32.partialorder %v678_v8, %v1498_v3  ;;  %v692_v62 = vor.u32 1.1754944e-38, %v691_v44  ;;  %vm690_vm14 = vcmp.eq.f32.partialorder %v689_v41, 8.507059e+37 }
 0x10a   :  { %1222 = vst [vmem:[%s2023_s6 + $0x20] sm:$0xff] %v1195_v25   ;;  %v775_v40 = vsel %vm758_vm13, %v1500_v4, 0.0  ;;  %v227_v52 = vadd.f32 %v226_v0, %v1494_v60 }
 0x10b   :  { %v1329_v15 = vpop.eup %1328  ;;  %v914_v42 = vmul.f32 %v902_v13, %v775_v40  ;;  %v693_v51 = vsel %vm690_vm14, %v692_v62, %v688_v20 }
 0x10c   :  { %v1200_v17 = vpack.c.bf16 %v1329_v15, %v1327_v1  ;;  %v1170_v39 = vpack.c.bf16 %v693_v51, %v678_v8  ;;  %vm759_vm15 = vcmp.gt.f32.partialorder %v693_v51, %v1498_v3 }
 0x10d   :  { %v919_v22 = vadd.f32 %v914_v42, %v225_v46  ;;  %v776_v47 = vsel %vm759_vm15, %v1500_v4, 0.0  ;;  %v1331_v50 = vpop.eup %1330 }
 0x10e   :  { %1223 = vst [vmem:[%s2023_s6 + $0x28] sm:$0xff] %v1200_v17   ;;  %v915_v53 = vmul.f32 %v903_v33, %v776_v47 }
 0x10f   :  { %v1333_v29 = vpop.eup %1332  ;;  %928 = vst [vmem:[%s2024_s7] sm:$0xff] %v919_v22  ;;  %1334 = vtanh.f32 %v919_v22 }
 0x110   :  { %v1205_v45 = vpack.c.bf16 %v1333_v29, %v1331_v50  ;;  %1218 = vst [vmem:[%s2022_s8 + $0x38] sm:$0xff] %v1170_v39   ;;  %v920_v3 = vadd.f32 %v915_v53, %v227_v52 }
 0x112   :  { %1224 = vst [vmem:[%s2023_s6 + $0x30] sm:$0xff] %v1205_v45   ;;  %1336 = vtanh.f32 %v920_v3 }
 0x113   :  { %929 = vst [vmem:[%s2024_s7 + $0x8] sm:$0xff] %v920_v3 }
 0x115   :  { %v1335_v60 = vpop.eup %1334 }
 0x118   :  { %v1337_v4 = vpop.eup %1336 }
 0x119   :  { %v1210_v7 = vpack.c.bf16 %v1337_v4, %v1335_v60 }
 0x11b   :  { %1225 = vst [vmem:[%s2023_s6 + $0x38] sm:$0xff] %v1210_v7  }

</bundles_post_ra>
